<compile_context>
chip_gen: v7x
topology: tpu7x:2x2x1
jax: 0.10.0
libtpu: 0.0.40
codegen_flags: <defaults>
</compile_context>

<pallas_src>
import jax
import jax.numpy as jnp
from jax.experimental import pallas as pl
from jax.experimental.pallas import tpu as pltpu

BN_EPS = 1e-5          # torch.nn.BatchNorm1d default eps
GIN_EPS = 0.0          # PyG GINConv default eps
LANE = 128             # vreg lane width
SUBLANE_BF16 = 16      # bf16 sublane tile


def _round_up(x, m):
    return (x + m - 1) // m * m


def _tjlnet_layer_kernel(adj_ref, x_ref, w1_ref, w2_ref, vec_ref, out_ref, h_ref):
    """One GIN layer per grid step. h_ref (VMEM scratch) carries activations."""
    layer = pl.program_id(0)

    @pl.when(layer == 0)
    def _():
        h_ref[...] = x_ref[...]                       # load padded input features

    h = h_ref[...]                                    # (Np, Hp) f32 activations

    # GIN sum-aggregation + self term: (1 + eps) * h + A @ h, eps = 0.
    # MXU matmul: bf16 operands, f32 accumulation.
    agg = jnp.dot(adj_ref[...], h.astype(jnp.bfloat16),
                  preferred_element_type=jnp.float32)
    z = h + agg                                       # f32 on the VPU

    w1 = w1_ref[0]                                    # (Hp, Hp) bf16
    w2 = w2_ref[0]                                    # (Hp, Hp) bf16
    vec = vec_ref[0]                                  # (4, Hp) f32
    b1, b2 = vec[0:1, :], vec[1:2, :]
    bn_scale, bn_shift = vec[2:3, :], vec[3:4, :]

    # GIN MLP: Linear -> ReLU -> Linear (bf16 MXU operands, f32 elementwise).
    z = jnp.dot(z.astype(jnp.bfloat16), w1, preferred_element_type=jnp.float32) + b1
    z = jnp.maximum(z, 0.0)
    z = jnp.dot(z.astype(jnp.bfloat16), w2, preferred_element_type=jnp.float32) + b2

    # Outer ReLU, then eval-mode BatchNorm1d folded to a per-feature affine.
    z = jnp.maximum(z, 0.0)
    z = z * bn_scale + bn_shift
    # TODO(synk): Dropout(p=0.5) is identity in eval mode; training-mode dropout
    # and batch-statistic BatchNorm are not implemented here.

    h_ref[...] = z                                    # feed next layer
    out_ref[...] = z                                  # lane-dense (Np, Hp) slab store


def tjlnet_forward(x, edge_index, layer_params):
    """x: (N, D_in) f32; edge_index: (2, E) int32 (row 0 = src, row 1 = dst).
    layer_params: list of (w1(in,H), b1(H,), w2(H,H), b2(H,), gamma, beta, mean, var).
    Returns (N, num_layers * H) == torch.cat(x_record, -1) in eval mode."""
    N, d_in0 = x.shape
    L = len(layer_params)
    H = layer_params[0][2].shape[1]

    Hp = _round_up(max(H, d_in0), LANE)               # lane-dense feature dim
    Np = _round_up(N, SUBLANE_BF16)                   # sublane-aligned node dim

    # Dense adjacency: adj[dst, src] = multiplicity of edge src -> dst (GINConv
    # sum-aggregates source messages at targets, no self-loops added). bf16 is
    # exact for small integer multiplicities.
    src, dst = edge_index[0], edge_index[1]
    adj = jnp.zeros((Np, Np), jnp.float32).at[dst, src].add(1.0).astype(jnp.bfloat16)

    # Zero-padded input features.
    xp = jnp.zeros((Np, Hp), jnp.float32).at[:N, :d_in0].set(x.astype(jnp.float32))

    # Pack per-layer params: W1/W2 stacks (bf16) + one (L, 4, Hp) f32 vector
    # stack for {b1, b2, bn_scale, bn_shift}. BN (eval) folded to scale/shift.
    w1s, w2s, vecs = [], [], []
    for (w1, b1, w2, b2, gamma, beta, mean, var) in layer_params:
        inv_std = 1.0 / jnp.sqrt(var + BN_EPS)
        bn_scale = gamma * inv_std
        bn_shift = beta - mean * bn_scale
        din = w1.shape[0]
        w1p = jnp.zeros((Hp, Hp), jnp.float32).at[:din, :H].set(w1)
        w2p = jnp.zeros((Hp, Hp), jnp.float32).at[:H, :H].set(w2)
        vec = (jnp.zeros((4, Hp), jnp.float32)
               .at[0, :H].set(b1).at[1, :H].set(b2)
               .at[2, :H].set(bn_scale).at[3, :H].set(bn_shift))
        w1s.append(w1p.astype(jnp.bfloat16))
        w2s.append(w2p.astype(jnp.bfloat16))
        vecs.append(vec)
    w1_stack = jnp.stack(w1s)      # (L, Hp, Hp) bf16
    w2_stack = jnp.stack(w2s)      # (L, Hp, Hp) bf16
    vec_stack = jnp.stack(vecs)    # (L, 4, Hp)  f32

    out = pl.pallas_call(
        _tjlnet_layer_kernel,
        out_shape=jax.ShapeDtypeStruct((Np, L * Hp), jnp.float32),
        grid_spec=pltpu.PrefetchScalarGridSpec(
            num_scalar_prefetch=0,
            grid=(L,),
            in_specs=[
                pl.BlockSpec((Np, Np), lambda l: (0, 0)),        # adj: resident
                pl.BlockSpec((Np, Hp), lambda l: (0, 0)),        # x:   resident
                pl.BlockSpec((1, Hp, Hp), lambda l: (l, 0, 0)),  # W1[l]: streamed
                pl.BlockSpec((1, Hp, Hp), lambda l: (l, 0, 0)),  # W2[l]: streamed
                pl.BlockSpec((1, 4, Hp), lambda l: (l, 0, 0)),   # vecs[l]: streamed
            ],
            out_specs=pl.BlockSpec((Np, Hp), lambda l: (0, l)),  # layer-l column slab
            scratch_shapes=[pltpu.VMEM((Np, Hp), jnp.float32)],  # activation carry
        ),
        compiler_params=pltpu.CompilerParams(
            # Layer axis carries activations -> must be sequential ("arbitrary").
            dimension_semantics=("arbitrary",),
            # Tiny here; raise for large N (v5e default scoped VMEM is only 16 MiB).
            vmem_limit_bytes=32 * 1024 * 1024,
        ),
    )(adj, xp, w1_stack, w2_stack, vec_stack)

    # (Np, L*Hp) -> (N, L*H): contiguous reshape + slice of the padding only
    # (no transpose, no extra HBM round trip of the activations).
    return out.reshape(Np, L, Hp)[:N, :, :H].reshape(N, L * H)


def reference_forward(x, edge_index, layer_params):
    """Pure-JAX f32 reference matching the PyTorch forward (eval, nodeNumList=None)."""
    N = x.shape[0]
    src, dst = edge_index[0], edge_index[1]
    adj = jnp.zeros((N, N), jnp.float32).at[dst, src].add(1.0)
    h = x.astype(jnp.float32)
    records = []
    for (w1, b1, w2, b2, gamma, beta, mean, var) in layer_params:
        z = (1.0 + GIN_EPS) * h + adj @ h
        z = jnp.maximum(z @ w1 + b1, 0.0)
        z = z @ w2 + b2
        z = jnp.maximum(z, 0.0)
        z = (z - mean) / jnp.sqrt(var + BN_EPS) * gamma + beta
        records.append(z)
        h = z
    return jnp.concatenate(records, axis=-1)


if __name__ == "__main__":
    # Small shapes consistent with the module: 16-node graph, hidden=32, 3 GIN layers.
    num_layers, input_dim, hidden_dim = 3, 32, 32
    num_nodes, num_edges = 16, 48

    key = jax.random.PRNGKey(0)
    keys = jax.random.split(key, 4 + 8 * num_layers)
    k_iter = iter(keys)

    x = jax.random.normal(next(k_iter), (num_nodes, input_dim), dtype=jnp.float32)
    src = jax.random.randint(next(k_iter), (num_edges,), 0, num_nodes, dtype=jnp.int32)
    dst = jax.random.randint(next(k_iter), (num_edges,), 0, num_nodes, dtype=jnp.int32)
    edge_index = jnp.stack([src, dst], axis=0)

    layer_params = []
    for i in range(num_layers):
        d_in = input_dim if i == 0 else hidden_dim
        w1 = 0.2 * jax.random.normal(next(k_iter), (d_in, hidden_dim), jnp.float32)
        b1 = 0.1 * jax.random.normal(next(k_iter), (hidden_dim,), jnp.float32)
        w2 = 0.2 * jax.random.normal(next(k_iter), (hidden_dim, hidden_dim), jnp.float32)
        b2 = 0.1 * jax.random.normal(next(k_iter), (hidden_dim,), jnp.float32)
        gamma = 1.0 + 0.1 * jax.random.normal(next(k_iter), (hidden_dim,), jnp.float32)
        beta = 0.1 * jax.random.normal(next(k_iter), (hidden_dim,), jnp.float32)
        mean = 0.1 * jax.random.normal(next(k_iter), (hidden_dim,), jnp.float32)
        var = 0.5 + jnp.abs(jax.random.normal(next(k_iter), (hidden_dim,), jnp.float32))
        layer_params.append((w1, b1, w2, b2, gamma, beta, mean, var))

    out = tjlnet_forward(x, edge_index, layer_params)
    out = jax.block_until_ready(out)
    assert out.shape == (num_nodes, num_layers * hidden_dim), out.shape

    # f32 reference; the kernel feeds the MXU bf16 operands (f32 accumulation),
    # so compare with a bf16-appropriate tolerance.
    ref = reference_forward(x, edge_index, layer_params)
    max_abs_err = float(jnp.max(jnp.abs(out - ref)))
    rel_err = max_abs_err / (float(jnp.max(jnp.abs(ref))) + 1e-6)
    assert rel_err < 3e-2, f"max abs err {max_abs_err}, rel err {rel_err}"

    print("KERNEL_OK")
</pallas_src>

<mosaic_0001>
module attributes {stable_mosaic.version = 11 : i64} {
  func.func @_tjlnet_layer_kernel(%arg0: i32, %arg1: memref<16x16xbf16, #tpu.memory_space<vmem>>, %arg2: memref<16x128xf32, #tpu.memory_space<vmem>>, %arg3: memref<1x128x128xbf16, #tpu.memory_space<vmem>>, %arg4: memref<1x128x128xbf16, #tpu.memory_space<vmem>>, %arg5: memref<1x4x128xf32, #tpu.memory_space<vmem>>, %arg6: memref<16x128xf32, #tpu.memory_space<vmem>>, %arg7: memref<16x128xf32, #tpu.memory_space<vmem>>) attributes {dimension_semantics = [#tpu.dimension_semantics<arbitrary>], iteration_bounds = array<i64: 3>, scalar_prefetch = 0 : i64, scratch_operands = 1 : i64, tpu.core_type = #tpu.core_type<tc>, window_params = [{pipeline_mode = #tpu.pipeline_mode<synchronous>, transform_indices = @transform_0, window_bounds = array<i64: 16, 16>}, {pipeline_mode = #tpu.pipeline_mode<synchronous>, transform_indices = @transform_1, window_bounds = array<i64: 16, 128>}, {transform_indices = @transform_2, window_bounds = array<i64: 1, 128, 128>}, {transform_indices = @transform_3, window_bounds = array<i64: 1, 128, 128>}, {transform_indices = @transform_4, window_bounds = array<i64: 1, 4, 128>}, {transform_indices = @transform_5, window_bounds = array<i64: 16, 128>}]} {
    %c0_i32 = arith.constant 0 : i32
    %0 = arith.cmpi eq, %arg0, %c0_i32 : i32
    %1 = arith.extui %0 : i1 to i32
    %c0_i32_0 = arith.constant 0 : i32
    %2 = arith.cmpi ne, %1, %c0_i32_0 : i32
    scf.if %2 {
      %c0_21 = arith.constant 0 : index
      %c0_22 = arith.constant 0 : index
      %36 = vector.load %arg2[%c0_21, %c0_22] : memref<16x128xf32, #tpu.memory_space<vmem>>, vector<16x128xf32>
      %c0_23 = arith.constant 0 : index
      %c0_24 = arith.constant 0 : index
      %37 = vector.load %arg7[%c0_23, %c0_24] : memref<16x128xf32, #tpu.memory_space<vmem>>, vector<16x128xf32>
      tpu.vector_store %arg7[%c0_23, %c0_24], %36 {strides = array<i32>} : memref<16x128xf32, #tpu.memory_space<vmem>>, vector<16x128xf32>,
    } else {
    }
    %c0 = arith.constant 0 : index
    %c0_1 = arith.constant 0 : index
    %3 = vector.load %arg7[%c0, %c0_1] : memref<16x128xf32, #tpu.memory_space<vmem>>, vector<16x128xf32>
    %c0_2 = arith.constant 0 : index
    %c0_3 = arith.constant 0 : index
    %4 = vector.load %arg1[%c0_2, %c0_3] : memref<16x16xbf16, #tpu.memory_space<vmem>>, vector<16x16xbf16>
    %5 = arith.truncf %3 : vector<16x128xf32> to vector<16x128xbf16>
    %cst = arith.constant dense<0.000000e+00> : vector<16x128xf32>
    %6 = tpu.matmul %4, %5, %cst {dimension_numbers = #tpu.dot_dimension_numbers<[1], [0], [0], [1], [0, 0, 1, 1], [], []>} : vector<16x16xbf16>, vector<16x128xbf16>, vector<16x128xf32> -> vector<16x128xf32>
    %7 = arith.addf %3, %6 : vector<16x128xf32>
    %c0_4 = arith.constant 0 : index
    %c0_5 = arith.constant 0 : index
    %c0_6 = arith.constant 0 : index
    %8 = vector.load %arg3[%c0_4, %c0_5, %c0_6] : memref<1x128x128xbf16, #tpu.memory_space<vmem>>, vector<1x128x128xbf16>
    %9 = vector.shape_cast %8 : vector<1x128x128xbf16> to vector<128x128xbf16>
    %c0_7 = arith.constant 0 : index
    %c0_8 = arith.constant 0 : index
    %c0_9 = arith.constant 0 : index
    %10 = vector.load %arg4[%c0_7, %c0_8, %c0_9] : memref<1x128x128xbf16, #tpu.memory_space<vmem>>, vector<1x128x128xbf16>
    %11 = vector.shape_cast %10 : vector<1x128x128xbf16> to vector<128x128xbf16>
    %c0_10 = arith.constant 0 : index
    %c0_11 = arith.constant 0 : index
    %c0_12 = arith.constant 0 : index
    %12 = vector.load %arg5[%c0_10, %c0_11, %c0_12] : memref<1x4x128xf32, #tpu.memory_space<vmem>>, vector<1x4x128xf32>
    %13 = vector.shape_cast %12 : vector<1x4x128xf32> to vector<4x128xf32>
    %14 = vector.extract_strided_slice %13 {offsets = [0, 0], sizes = [1, 128], strides = [1, 1]} : vector<4x128xf32> to vector<1x128xf32>
    %15 = vector.extract_strided_slice %13 {offsets = [1, 0], sizes = [1, 128], strides = [1, 1]} : vector<4x128xf32> to vector<1x128xf32>
    %16 = vector.extract_strided_slice %13 {offsets = [2, 0], sizes = [1, 128], strides = [1, 1]} : vector<4x128xf32> to vector<1x128xf32>
    %17 = vector.extract_strided_slice %13 {offsets = [3, 0], sizes = [1, 128], strides = [1, 1]} : vector<4x128xf32> to vector<1x128xf32>
    %18 = arith.truncf %7 : vector<16x128xf32> to vector<16x128xbf16>
    %cst_13 = arith.constant dense<0.000000e+00> : vector<16x128xf32>
    %19 = tpu.matmul %18, %9, %cst_13 {dimension_numbers = #tpu.dot_dimension_numbers<[1], [0], [0], [1], [0, 0, 1, 1], [], []>} : vector<16x128xbf16>, vector<128x128xbf16>, vector<16x128xf32> -> vector<16x128xf32>
    %20 = vector.broadcast %14 : vector<1x128xf32> to vector<16x128xf32>
    %21 = arith.addf %19, %20 : vector<16x128xf32>
    %cst_14 = arith.constant 0.000000e+00 : f32
    %22 = vector.broadcast %cst_14 : f32 to vector<16x128xf32>
    %23 = arith.maximumf %21, %22 : vector<16x128xf32>
    %24 = arith.truncf %23 : vector<16x128xf32> to vector<16x128xbf16>
    %cst_15 = arith.constant dense<0.000000e+00> : vector<16x128xf32>
    %25 = tpu.matmul %24, %11, %cst_15 {dimension_numbers = #tpu.dot_dimension_numbers<[1], [0], [0], [1], [0, 0, 1, 1], [], []>} : vector<16x128xbf16>, vector<128x128xbf16>, vector<16x128xf32> -> vector<16x128xf32>
    %26 = vector.broadcast %15 : vector<1x128xf32> to vector<16x128xf32>
    %27 = arith.addf %25, %26 : vector<16x128xf32>
    %cst_16 = arith.constant 0.000000e+00 : f32
    %28 = vector.broadcast %cst_16 : f32 to vector<16x128xf32>
    %29 = arith.maximumf %27, %28 : vector<16x128xf32>
    %30 = vector.broadcast %16 : vector<1x128xf32> to vector<16x128xf32>
    %31 = arith.mulf %29, %30 : vector<16x128xf32>
    %32 = vector.broadcast %17 : vector<1x128xf32> to vector<16x128xf32>
    %33 = arith.addf %31, %32 : vector<16x128xf32>
    %c0_17 = arith.constant 0 : index
    %c0_18 = arith.constant 0 : index
    %34 = vector.load %arg7[%c0_17, %c0_18] : memref<16x128xf32, #tpu.memory_space<vmem>>, vector<16x128xf32>
    tpu.vector_store %arg7[%c0_17, %c0_18], %33 {strides = array<i32>} : memref<16x128xf32, #tpu.memory_space<vmem>>, vector<16x128xf32>,
    %c0_19 = arith.constant 0 : index
    %c0_20 = arith.constant 0 : index
    %35 = vector.load %arg6[%c0_19, %c0_20] : memref<16x128xf32, #tpu.memory_space<vmem>>, vector<16x128xf32>
    tpu.vector_store %arg6[%c0_19, %c0_20], %33 {strides = array<i32>} : memref<16x128xf32, #tpu.memory_space<vmem>>, vector<16x128xf32>,
    return
  }
  func.func @transform_0(%arg0: i32) -> (i32, i32) {
    %c0_i32 = arith.constant 0 : i32
    %c0_i32_0 = arith.constant 0 : i32
    %c0_i32_1 = arith.constant 0 : i32
    return %c0_i32, %c0_i32_0 : i32, i32
  }
  func.func @transform_1(%arg0: i32) -> (i32, i32) {
    %c0_i32 = arith.constant 0 : i32
    %c0_i32_0 = arith.constant 0 : i32
    %c0_i32_1 = arith.constant 0 : i32
    return %c0_i32, %c0_i32_0 : i32, i32
  }
  func.func @transform_2(%arg0: i32) -> (i32, i32, i32) {
    %c0_i32 = arith.constant 0 : i32
    %c0_i32_0 = arith.constant 0 : i32
    %c0_i32_1 = arith.constant 0 : i32
    return %arg0, %c0_i32, %c0_i32_0 : i32, i32, i32
  }
  func.func @transform_3(%arg0: i32) -> (i32, i32, i32) {
    %c0_i32 = arith.constant 0 : i32
    %c0_i32_0 = arith.constant 0 : i32
    %c0_i32_1 = arith.constant 0 : i32
    return %arg0, %c0_i32, %c0_i32_0 : i32, i32, i32
  }
  func.func @transform_4(%arg0: i32) -> (i32, i32, i32) {
    %c0_i32 = arith.constant 0 : i32
    %c0_i32_0 = arith.constant 0 : i32
    %c0_i32_1 = arith.constant 0 : i32
    return %arg0, %c0_i32, %c0_i32_0 : i32, i32, i32
  }
  func.func @transform_5(%arg0: i32) -> (i32, i32) {
    %c0_i32 = arith.constant 0 : i32
    %c0_i32_0 = arith.constant 0 : i32
    return %c0_i32, %arg0 : i32, i32
  }
}

</mosaic_0001>

<bundles_post_ra>
// kernel: tpu_custom_call.1
= control target key start
LH: loop header
LB: loop body
LE: loop exit
PB: predicated region body
PF: predicated region fallthrough
CT: control target
= control target key end

     0   :  { %s1545_s0 = inlined_call_operand.hbm [shape: bf16[16,16], index: 0, kind: input, shape index: {}]   ;;  %s1546_s1 = inlined_call_operand.hbm [shape: f32[16,128], index: 1, kind: input, shape index: {}]   ;;  %s1547_s2 = inlined_call_operand.hbm [shape: bf16[3,128,128], index: 2, kind: input, shape index: {}]   ;;  %s1548_s3 = inlined_call_operand.hbm [shape: bf16[3,128,128], index: 3, kind: input, shape index: {}]   ;;  %s1549_s4 = inlined_call_operand.vmem [shape: f32[3,4,128], index: 4, kind: input, shape index: {}]   ;;  %s1550_s5 = inlined_call_operand.hbm [shape: f32[16,384], index: 5, kind: output, shape index: {}]  }
   0x1   :  { %1563 = sst [smem:[#allocation16_spill]] %s1545_s0 }
   0x2   :  { %1564 = sst [smem:[#allocation17_spill]] %s1547_s2 }
   0x3   :  { %10 = vsyncpa [#allocation4], 0 }
   0x4   :  { %11 = vsyncpa [#allocation7], 0 }
   0x5   :  { %12 = vsyncpa [#allocation5], 0 }
   0x6   :  { %14 = vsyncpa [#allocation5 + $0x1], 0  ;;  %s1211_s18 = smov 0   ;;  %s1213_s19 = smov 0  }
   0x7   :  { %s1215_s20 = smov 0   ;;  %s1217_s21 = smov 0  }
   0x8 LB: > { %s1232_s22 = sadd.s32 4294967295, %s1165_s21   ;;  %s768_s23 = sadd.s32 4294967294, %s1165_s21   ;;  %s1165_s21 = sphi %s1217_s21, %s1598_s21   ;;  %s1161_s20 = sphi %s1215_s20, %s1597_s20   ;;  %s1157_s19 = sphi %s1213_s19, %s1596_s19   ;;  %s1153_s18 = sphi %s1211_s18, %s1595_s18  }
   0x9   : > { %s1236_s24 = sadd.s32 1, %s1165_s21   ;;  %s69_s25 = sadd.s32 1, %s1161_s20 }
   0xa   : > { %s66_s26 = ssub.s32 %s1165_s21, %s1236_s24  ;;  %p76_p0 = scmp.ne.s32.totalorder %s1161_s20, %s1157_s19 }
   0xb   : > { %p67_p1 = scmp.eq.s32.totalorder %s66_s26, 0  ;;  %p77_p2 = scmp.eq.s32.totalorder %s1165_s21, 0 }
   0xc   : > { %p82_p3 = scmp.ne.s32.totalorder %s1157_s19, %s1153_s18  ;;  %p1551_p4 = scmp.eq.s32.totalorder %s1232_s22, 0 }
   0xd   : > { %s1248_s27 = scalar_select %p67_p1, %s1161_s20, %s69_s25  }
   0xe   : > { %p1250_p5 = por %p77_p2, %p76_p0  ;;  %p1256_p6 = por %p1551_p4, %p82_p3 }
   0xf   : > { %1565 = sst [smem:[#allocation15_spill]] %s1248_s27  ;;  %p158_p7 = scmp.eq.s32.totalorder %s1232_s22, 2 }
  0x10   : > { %s1566_s28 = scalar_select %p1250_p5, 1, 0 }
  0x11   : > { %s1567_s29 = scalar_select %p1256_p6, 1, 0 }
  0x12   : > { %p164_p8 = scmp.eq.s32.totalorder %s768_s23, 2  ;;  %p769_p9 = scmp.ge.s32.totalorder %s1165_s21, 1 }
  0x13   : > { %p171_p10 = scmp.lt.s32.totalorder %s1165_s21, 4  ;;  %p1263_p11 = por %p158_p7, %p76_p0 }
  0x14   : > { %p1267_p12 = por %p164_p8, %p82_p3  ;;  %s1167_s8 = smov [#allocation3]  }
  0x15   : > { %s1568_s30 = scalar_select %p1263_p11, 1, 0 }
  0x16   : > { %s1569_s6 = scalar_select %p1267_p12, 1, 0 }
  0x17   : > { %p1271_p13 = pnand %p769_p9, %p171_p10  ;;  %s183_s9 = sshll.u32 %s1167_s8, 4  ;;  %s184_s9 = int_to_ptr.vmem [resolvable:$true] %s183_s9 }
  0x18   : > { %s210_s11 = sand.u32 1, %s1165_s21   ;;  %s1572_s0 = sld [smem:[#allocation16_spill]] }
  0x19   : > { %s1570_s7 = scalar_select %p1271_p13, 1, 0 }
  0x1a   : > { %p891_p2 = pneg %p1271_p13 }
  0x1c   : > { %p1280_p0 = pnand %p891_p2, %p1551_p4 }
  0x1e   : > { %s975_s14 = scalar_lea.hbm %s1572_s0, 128  ;;  %p1558_p8 = pneg %p1280_p0 }
  0x1f   : > { %p976_p7 = scmp.ne.s32.totalorder %s1572_s0, %s975_s14  ;;  %p982_p2 = scmp.lt.u32.totalorder %s975_s14, %s1572_s0 }
  0x21   : > { %p978_p9 = pnand %p1558_p8, %p976_p7 }
  0x23   : > { %p979_p10 = pneg %p978_p9 }
  0x25   : > { %p984_p1 = pnand %p982_p2, %p979_p10 }
  0x27   : > { %987 = shalt.err (!%p984_p1)
}
  0x28   : > { %s988_s25 = scalar_lea.vmem %s184_s9, 128  ;;  %p996_p11 = scmp.lt.s32.totalorder %s184_s9, %s184_s9 }
  0x29   : > { %p989_p4 = scmp.ne.s32.totalorder %s184_s9, %s988_s25  ;;  %p997_p6 = scmp.lt.s32.totalorder %s988_s25, %s988_s25 }
  0x2b   : > { %p991_p3 = pnand %p989_p4, %p1558_p8  ;;  %p998_p13 = por %p997_p6, %p996_p11 }
  0x2d   : > { %p992_p12 = pneg %p991_p3 }
  0x2f   : > { %p999_p5 = pnand %p998_p13, %p992_p12 }
  0x31   : > { %1002 = shalt.err (!%p999_p5)
}
  0x32   : > { %s1556_s26 = smov 64   ;;  %s1562_s8 = smov 4  }
  0x33   : > { %894 = dma.hbm_to_vmem [thread:$0]  (!%p1280_p0), %s1572_s0, 128, %s184_s9, [#allocation4], %s1556_s26, %s1556_s26, %s1562_s8  }
  0x34   : > { %p1573_p4 = scmp.ne.s32.totalorder %s1566_s28, 0  ;;  %p1574_p6 = scmp.lt.s32.totalorder %s1165_s21, 3 }
  0x35   : > { %s212_s15 = sand.u32 1, %s1161_s20   ;;  %s1555_s17 = sshll.u32 %s1165_s21, 10 }
  0x36   : > { %p1315_p11 = pnand %p1574_p6, %p1573_p4  ;;  %s1320_s16 = sshll.u32 %s212_s15, 6 }
  0x37   : > { %s1576_s2 = sld [smem:[#allocation17_spill]]  ;;  %s214_s28 = scalar_lea.vmem [#allocation8], %s1320_s16 }
  0x38   : > { %s1575_s14 = scalar_select %p1315_p11, 1, 0 }
  0x39   : > { %s221_s9 = sshll.u32 %s214_s28, 4  ;;  %s1333_s12 = scalar_lea.sflag [#allocation4], %s210_s11  ;;  %s1331_s9 = int_to_ptr.vmem [resolvable:$true] %s221_s9 }
  0x3a   : > { %p1559_p12 = pneg %p1315_p11 }
  0x3d   : > { %s1328_s27 = scalar_lea.hbm %s1576_s2, %s1555_s17  ;;  %s1008_s25 = scalar_lea.hbm %s1576_s2, 3072 }
  0x3e   : > { %s1003_s13 = scalar_lea.hbm %s1328_s27, 1024  ;;  %p1009_p3 = scmp.lt.u32.totalorder %s1328_s27, %s1576_s2 }
  0x3f   : > { %p1004_p5 = scmp.ne.s32.totalorder %s1328_s27, %s1003_s13  ;;  %p1010_p7 = scmp.lt.u32.totalorder %s1008_s25, %s1003_s13 }
  0x40   : > { %p1012_p10 = scmp.lt.u32.totalorder %s1003_s13, %s1328_s27 }
  0x41   : > { %p1006_p13 = pnand %p1559_p12, %p1004_p5  ;;  %p1011_p9 = por %p1010_p7, %p1009_p3 }
  0x43   : > { %p1007_p1 = pneg %p1006_p13  ;;  %p1013_p2 = por %p1012_p10, %p1011_p9 }
  0x45   : > { %p1014_p4 = pnand %p1013_p2, %p1007_p1 }
  0x47   : > { %1017 = shalt.err (!%p1014_p4)
}
  0x48   : > { %s1018_s11 = scalar_lea.vmem %s1331_s9, 1024  ;;  %s1170_s28 = smov [#allocation8]  }
  0x49   : > { %p1019_p6 = scmp.ne.s32.totalorder %s1331_s9, %s1018_s11  ;;  %s1023_s15 = sshll.u32 %s1170_s28, 4  ;;  %s1024_s15 = int_to_ptr.vmem [resolvable:$false] %s1023_s15 }
  0x4a   : > { %s1025_s26 = scalar_lea.vmem %s1024_s15, 2048  ;;  %p1026_p8 = scmp.lt.s32.totalorder %s1331_s9, %s1024_s15 }
  0x4b   : > { %p1021_p5 = pnand %p1019_p6, %p1559_p12  ;;  %p1027_p3 = scmp.lt.s32.totalorder %s1025_s26, %s1018_s11 }
  0x4d   : > { %p1022_p13 = pneg %p1021_p5  ;;  %p1028_p7 = por %p1027_p3, %p1026_p8 }
  0x4f   : > { %p1029_p9 = pnand %p1028_p7, %p1022_p13 }
  0x51   : > { %1032 = shalt.err (!%p1029_p9)
}
  0x52   : > { %s1577_s17 = smov 64   ;;  %s1171_s13 = smov [#allocation6]  }
  0x53   : > { %901 = dma.hbm_to_vmem [thread:$0]  (!%p1315_p11), %s1328_s27, 1024, %s1331_s9, %s1333_s12, %s1577_s17, %s1577_s17, %s1562_s8  }
  0x54   : > { %s196_s23 = sshll.u32 %s1171_s13, 4  ;;  %s1033_s11 = scalar_lea.hbm %s1546_s1, 256  ;;  %s197_s23 = int_to_ptr.vmem [resolvable:$true] %s196_s23 }
  0x55   : > { %p1034_p8 = scmp.ne.s32.totalorder %s1546_s1, %s1033_s11  ;;  %p1578_p1 = pneg %p1280_p0 }
  0x56   : > { %p1040_p4 = scmp.lt.u32.totalorder %s1033_s11, %s1546_s1 }
  0x57   : > { %p1036_p10 = pnand %p1034_p8, %p1578_p1 }
  0x59   : > { %p1037_p2 = pneg %p1036_p10 }
  0x5b   : > { %p1042_p6 = pnand %p1040_p4, %p1037_p2 }
  0x5d   : > { %1045 = shalt.err (!%p1042_p6)
}
  0x5e   : > { %s1046_s27 = scalar_lea.vmem %s197_s23, 256  ;;  %p1579_p13 = pmov %p1578_p1 }
  0x5f   : > { %p1047_p5 = scmp.ne.s32.totalorder %s197_s23, %s1046_s27  ;;  %p1054_p9 = scmp.lt.s32.totalorder %s197_s23, %s197_s23 }
  0x60   : > { %p1055_p12 = scmp.lt.s32.totalorder %s1046_s27, %s1046_s27 }
  0x61   : > { %p1049_p3 = pnand %p1047_p5, %p1579_p13 }
  0x62   : > { %p1056_p11 = por %p1055_p12, %p1054_p9 }
  0x63   : > { %p1050_p7 = pneg %p1049_p3 }
  0x65   : > { %p1057_p1 = pnand %p1056_p11, %p1050_p7 }
  0x67   : > { %1060 = shalt.err (!%p1057_p1)
}
  0x68   : > { %s1172_s9 = smov 128   ;;  %s1173_s0 = smov 8  }
  0x69   : > { %897 = dma.hbm_to_vmem [thread:$0]  (!%p1280_p0), %s1546_s1, 256, %s197_s23, [#allocation7], %s1172_s9, %s1172_s9, %s1173_s0  }
  0x6a   : > { %s1580_s25 = sshll.u32 %s1165_s21, 10  ;;  %s235_s26 = scalar_lea.vmem [#allocation9], %s1320_s16 }
  0x6b   : > { %s1389_s15 = scalar_lea.hbm %s1548_s3, %s1580_s25  ;;  %s242_s27 = sshll.u32 %s235_s26, 4  ;;  %s1392_s27 = int_to_ptr.vmem [resolvable:$true] %s242_s27 }
  0x6c   : > { %s1061_s8 = scalar_lea.hbm %s1389_s15, 1024  ;;  %p1581_p12 = scmp.ne.s32.totalorder %s1575_s14, 0 }
  0x6d   : > { %p1062_p11 = scmp.ne.s32.totalorder %s1389_s15, %s1061_s8  ;;  %s1066_s9 = scalar_lea.hbm %s1548_s3, 3072 }
  0x6e   : > { %p1582_p8 = pneg %p1581_p12  ;;  %p1067_p2 = scmp.lt.u32.totalorder %s1389_s15, %s1548_s3 }
  0x6f   : > { %p1068_p4 = scmp.lt.u32.totalorder %s1066_s9, %s1061_s8  ;;  %p1070_p5 = scmp.lt.u32.totalorder %s1061_s8, %s1389_s15 }
  0x70   : > { %p1064_p10 = pnand %p1062_p11, %p1582_p8 }
  0x71   : > { %p1069_p6 = por %p1068_p4, %p1067_p2 }
  0x72   : > { %p1065_p0 = pneg %p1064_p10 }
  0x73   : > { %p1071_p13 = por %p1070_p5, %p1069_p6 }
  0x75   : > { %p1072_p3 = pnand %p1071_p13, %p1065_p0 }
  0x77   : > { %1075 = shalt.err (!%p1072_p3)
}
  0x78   : > { %s1076_s16 = scalar_lea.vmem %s1392_s27, 1024  ;;  %p1583_p9 = pmov %p1582_p8 }
  0x79   : > { %p1077_p7 = scmp.ne.s32.totalorder %s1392_s27, %s1076_s16  ;;  %s1174_s13 = smov [#allocation9]  }
  0x7a   : > { %s1081_s25 = sshll.u32 %s1174_s13, 4  ;;  %s1082_s25 = int_to_ptr.vmem [resolvable:$false] %s1081_s25 }
  0x7b   : > { %p1079_p1 = pnand %p1077_p7, %p1583_p9  ;;  %s1083_s28 = scalar_lea.vmem %s1082_s25, 2048 }
  0x7c   : > { %p1084_p8 = scmp.lt.s32.totalorder %s1392_s27, %s1082_s25  ;;  %p1085_p10 = scmp.lt.s32.totalorder %s1083_s28, %s1076_s16 }
  0x7d   : > { %p1080_p11 = pneg %p1079_p1 }
  0x7e   : > { %p1086_p2 = por %p1085_p10, %p1084_p8 }
  0x80   : > { %p1087_p4 = pnand %p1086_p2, %p1080_p11 }
  0x82   : > { %1090 = shalt.err (!%p1087_p4)
}
  0x83   : > { %s1584_s8 = smov 4   ;;  %p1585_p0 = scmp.ne.s32.totalorder %s1570_s7, 0 }
  0x84   : > { %904 = dma.hbm_to_vmem [thread:$0]  (!%p1581_p12), %s1389_s15, 1024, %s1392_s27, %s1333_s12, %s1577_s17, %s1577_s17, %s1584_s8  }
  0x85   : > { %261 = sbr.rel (%p1585_p0) target bundleno = 844 (0x34c), region = 40  ;;  %p1586_p6 = scmp.eq.s32.totalorder (!%p1585_p0), %s1232_s22, 0 }
  0x8c   : > { %1136 = dma.done.wait (%p1586_p6), [#allocation4], 128   ;;  %p1587_p5 = pmov %p1586_p6 }
  0x8e   : > { %1138 = vsyncadd (%p1587_p5), [#allocation4], 4294967168  ;;  %p1588_p13 = pmov %p1587_p5 }
  0x8f   : > { %p1589_p3 = pmov %p1587_p5 }
  0x90   : > { %1140 = dma.done.wait (%p1588_p13), [#allocation7], 256  }
  0x91   : > { %1142 = vsyncadd (%p1589_p3), [#allocation7], 4294967040  ;;  %s271_s14 = sand.u32 1, %s1232_s22   ;;  %s1433_s12 = sand.u32 1, %s1157_s19  }
  0x92   : > { %s782_s7 = sshll.u32 %s1433_s12, 6  ;;  %s272_s17 = scalar_lea.sflag [#allocation4], %s271_s14 }
  0x93   : > { %s1436_s11 = scalar_lea.vmem [#allocation8], %s782_s7  ;;  %p1590_p12 = scmp.ne.s32.totalorder %s1567_s29, 0 }
  0x95   : > { %1144 = dma.done.wait (%p1590_p12), %s272_s17, 2048  }
  0x96   : > { %1146 = vsyncadd (%p1590_p12), %s272_s17, 4294965248  ;;  %s784_s15 = sshll.u32 %s1433_s12, 4  ;;  %p320_p7 = scmp.lt.s32.totalorder %s1232_s22, 2 }
  0x97   : > { %s1450_s0 = scalar_lea.vmem [#allocation9], %s782_s7  ;;  %s1452_s2 = scalar_lea.vmem [#allocation10], %s784_s15 }
  0x98   : > { %s321_s26 = scalar_select %p320_p7, %s1232_s22, 2 }
  0x99   : > { %p1591_p9 = scmp.ne.s32.totalorder %s1232_s22, 0 }
  0x9a   : > { %s785_s27 = sshll.u32 %s321_s26, 2  ;;  %v329_v0 = vld [vmem:[#allocation6] sm:$0xff] (!%p1591_p9)  ;;  %v330_v1 = vld [vmem:[#allocation6 + $0x8] sm:$0xff] (!%p1591_p9) }
  0x9b   : > { %s1448_s9 = scalar_lea.vmem %s1549_s4, %s785_s27  ;;  %328 = sbr.rel (%p1591_p9) target bundleno = 162 (0xa2), region = 60  ;;  %331 = vst [vmem:[#allocation2] sm:$0xff] (!%p1591_p9), %v329_v0  ;;  %332 = vst [vmem:[#allocation2 + $0x8] sm:$0xff] (!%p1591_p9), %v330_v1 }
  0xa2 PF: > { %v333_v2 = vld [vmem:[#allocation2] sm:$0xff]  ;;  %v334_v3 = vld [vmem:[#allocation2 + $0x8] sm:$0xff]  ;;  %v1175_v4 = vmov 0.0   ;;  %vm1176_vm0 = vmmov 0   ;;  %v958_v6 = vld [vmem:[#allocation3] sm:$0xff]   ;;  %vm343_vm1 = vcmask 130048   ;;  %v424_v30 = vlaneseq }
  0xa3   : > { %831 = vmatprep.subr.bf16.mxu0 %v1175_v4  ;;  %v337_v5 = vpack.c.bf16 %v334_v3, %v333_v2  ;;  %833 = vmatprep.mubr.msk.bf16.mxu0 %vm1176_vm0, %v1175_v4  ;;  %v959_v7 = vld [vmem:[%s1436_s11] sm:$0xff]   ;;  %v960_v8 = vld [vmem:[%s1436_s11 + $0x8] sm:$0xff]   ;;  %v961_v9 = vld [vmem:[%s1436_s11 + $0x10] sm:$0xff]   ;;  %s806_s29 = sshll.u32 %s1232_s22, 7  ;;  %s644_s16 = sshll.u32 %s1452_s2, 4  ;;  %s1500_s16 = int_to_ptr.vmem [resolvable:$true] %s644_s16 }
  0xa4   : > { %837 = vmatprep.subr.bf16.mxu1 %v1175_v4  ;;  %853 = vmatprep.mubr.msk.bf16.mxu1 %vm1176_vm0, %v1175_v4  ;;  %v962_v10 = vld [vmem:[%s1436_s11 + $0x18] sm:$0xff]   ;;  %v963_v11 = vld [vmem:[%s1436_s11 + $0x20] sm:$0xff]   ;;  %v964_v12 = vld [vmem:[%s1436_s11 + $0x28] sm:$0xff]   ;;  %v425_v31 = vshrl.u32 %v424_v30, 7  ;;  %s1498_s28 = scalar_lea.hbm %s1550_s5, %s806_s29  ;;  %s632_s22 = scalar_lea.sflag [#allocation5], %s1433_s12 }
  0xa5   : > { %832 = vmatpush3.bf16.msra.mxu0 %v337_v5  ;;  %838 = vmatpush3.bf16.msra.mxu1 %v959_v7  ;;  %v965_v13 = vld [vmem:[%s1436_s11 + $0x30] sm:$0xff]   ;;  %v966_v14 = vld [vmem:[%s1436_s11 + $0x38] sm:$0xff]   ;;  %v967_v15 = vld [vmem:[%s1450_s0] sm:$0xff]   ;;  %s1091_s8 = scalar_lea.vmem %s1500_s16, 256  ;;  %p1592_p11 = scmp.ne.s32.totalorder %s1568_s30, 0 }
  0xa6   : > { %857 = vmatprep.subr.bf16.mxu0 %v1175_v4  ;;  %839 = vmatprep.subr.bf16.mxu1 %v1175_v4  ;;  %v968_v16 = vld [vmem:[%s1450_s0 + $0x8] sm:$0xff]   ;;  %v969_v17 = vld [vmem:[%s1450_s0 + $0x10] sm:$0xff]   ;;  %v970_v18 = vld [vmem:[%s1450_s0 + $0x18] sm:$0xff]   ;;  %v426_v32 = vsub.s32 0, %v425_v31  ;;  %v522_v44 = vsub.s32 1, %v425_v31  ;;  %v617_v46 = vsub.s32 2, %v425_v31  ;;  %p1092_p1 = scmp.ne.s32.totalorder %s1500_s16, %s1091_s8 }
  0xa7   : > { %v971_v19 = vld [vmem:[%s1450_s0 + $0x20] sm:$0xff]   ;;  %v972_v20 = vld [vmem:[%s1450_s0 + $0x28] sm:$0xff]   ;;  %v973_v28 = vld [vmem:[%s1450_s0 + $0x30] sm:$0xff]   ;;  %v623_v47 = vsub.s32 3, %v425_v31  ;;  %s1177_s14 = smov [#allocation10]  }
  0xa8   : > { %834 = vmatmul.mubr.msk.bf16.vlgmr.msra.gmra.mrb[0].mxu0 %vm343_vm1, %v958_v6  ;;  %v974_v29 = vld [vmem:[%s1450_s0 + $0x38] sm:$0xff]   ;;  %v422_v33 = vld [vmem:[%s1448_s9] sm:$0xf]  ;;  %p1093_p8 = pnand %p1092_p1, %p1592_p11  ;;  %s1095_s7 = sshll.u32 %s1177_s14, 4  ;;  %s1096_s7 = int_to_ptr.vmem [resolvable:$false] %s1095_s7 }
  0xa9   : > { %873 = vmatprep.mubr.msk.bf16.mxu0 %vm1176_vm0, %v1175_v4  ;;  %840 = vmatpush3.bf16.msra.mxu1 %v960_v8  ;;  %v427_v34 = vrot.slane %v422_v33, %v426_v32  ;;  %v523_v45 = vrot.slane %v422_v33, %v522_v44  ;;  %v618_v50 = vrot.slane %v422_v33, %v617_v46  ;;  %s1097_s17 = scalar_lea.vmem %s1096_s7, 512  ;;  %p1098_p2 = scmp.lt.s32.totalorder %s1500_s16, %s1096_s7 }
  0xaa   : > { %841 = vmatprep.subr.bf16.mxu1 %v1175_v4  ;;  %858 = vmatpush3.bf16.msra.mxu0 %v967_v15  ;;  %v624_v54 = vrot.slane %v422_v33, %v623_v47  ;;  %p1094_p10 = pneg %p1093_p8  ;;  %p1099_p4 = scmp.lt.s32.totalorder %s1097_s17, %s1091_s8 }
  0xab   : > { %859 = vmatprep.subr.bf16.mxu0 %v1175_v4 }
  0xac   : > { %p1100_p0 = por %p1099_p4, %p1098_p2 }
  0xad   : > { %842 = vmatpush3.bf16.msra.mxu1 %v961_v9 }
  0xae   : > { %843 = vmatprep.subr.bf16.mxu1 %v1175_v4  ;;  %860 = vmatpush3.bf16.msra.mxu0 %v968_v16  ;;  %p1101_p6 = pnand %p1100_p0, %p1094_p10 }
  0xaf   : > { %861 = vmatprep.subr.bf16.mxu0 %v1175_v4 }
  0xb1   : > { %844 = vmatpush3.bf16.msra.mxu1 %v962_v10 }
  0xb2   : > { %845 = vmatprep.subr.bf16.mxu1 %v1175_v4  ;;  %862 = vmatpush3.bf16.msra.mxu0 %v969_v17 }
  0xb3   : > { %863 = vmatprep.subr.bf16.mxu0 %v1175_v4 }
  0xb5   : > { %846 = vmatpush3.bf16.msra.mxu1 %v963_v11 }
  0xb6   : > { %847 = vmatprep.subr.bf16.mxu1 %v1175_v4  ;;  %864 = vmatpush3.bf16.msra.mxu0 %v970_v18 }
  0xb7   : > { %865 = vmatprep.subr.bf16.mxu0 %v1175_v4 }
  0xb9   : > { %848 = vmatpush3.bf16.msra.mxu1 %v964_v12 }
  0xba   : > { %849 = vmatprep.subr.bf16.mxu1 %v1175_v4  ;;  %866 = vmatpush3.bf16.msra.mxu0 %v971_v19 }
  0xbb   : > { %867 = vmatprep.subr.bf16.mxu0 %v1175_v4 }
  0xbd   : > { %850 = vmatpush3.bf16.msra.mxu1 %v965_v13 }
  0xbe   : > { %851 = vmatprep.subr.bf16.mxu1 %v1175_v4  ;;  %868 = vmatpush3.bf16.msra.mxu0 %v972_v20 }
  0xbf   : > { %869 = vmatprep.subr.bf16.mxu0 %v1175_v4 }
  0xc1   : > { %852 = vmatpush3.bf16.msra.mxu1 %v966_v14 }
  0xc2   : > { %870 = vmatpush3.bf16.msra.mxu0 %v973_v28 }
  0xc3   : > { %871 = vmatprep.subr.bf16.mxu0 %v1175_v4 }
  0xc6   : > { %872 = vmatpush3.bf16.msra.mxu0 %v974_v29 }
 0x17b   : > { %v381_v21 = vpop.f32.mrb[0].mxu0 }
 0x17c   : > { %v835_v22 = vpop.f32.mrb[1].mxu0  ;;  %v388_v24 = vadd.f32 %v381_v21, %v333_v2 }
 0x17d   : > { %v384_v23 = vpop.f32.mrb[2].mxu0 }
 0x17e   : > { %v389_v25 = vadd.f32 %v384_v23, %v334_v3  ;;  %v836_v26 = vpop.f32.mrb[3].mxu0 }
 0x180   : > { %v423_v27 = vpack.c.bf16 %v389_v25, %v388_v24 }
 0x182   : > { %854 = vmatmul.mubr.bf16.vlgmr.msra.gmra.mrb[0].mxu1 %v423_v27 }
 0x255   : > { %v510_v35 = vpop.f32.mrb[0].mxu1 }
 0x256   : > { %v511_v36 = vadd.f32 %v510_v35, %v427_v34  ;;  %v855_v37 = vpop.f32.mrb[1].mxu1 }
 0x257   : > { %v513_v38 = vpop.f32.mrb[2].mxu1 }
 0x258   : > { %v514_v39 = vadd.f32 %v513_v38, %v427_v34  ;;  %v856_v40 = vpop.f32.mrb[3].mxu1  ;;  %v517_v41 = vmax.f32 %v511_v36, 0.0 }
 0x25a   : > { %v518_v42 = vmax.f32 %v514_v39, 0.0 }
 0x25c   : > { %v519_v43 = vpack.c.bf16 %v518_v42, %v517_v41 }
 0x25e   : > { %874 = vmatmul.mubr.bf16.vlgmr.msra.gmra.mrb[4].mxu0 %v519_v43 }
 0x331   : > { %v606_v48 = vpop.f32.mrb[4].mxu0 }
 0x332   : > { %v607_v49 = vadd.f32 %v606_v48, %v523_v45  ;;  %v875_v51 = vpop.f32.mrb[5].mxu0 }
 0x333   : > { %v609_v52 = vpop.f32.mrb[6].mxu0 }
 0x334   : > { %v613_v53 = vmax.f32 %v607_v49, 0.0  ;;  %v610_v55 = vadd.f32 %v609_v52, %v523_v45  ;;  %v876_v56 = vpop.f32.mrb[7].mxu0 }
 0x336   : > { %v619_v57 = vmul.f32 %v618_v50, %v613_v53  ;;  %v614_v58 = vmax.f32 %v610_v55, 0.0 }
 0x338   : > { %v625_v59 = vadd.f32 %v624_v54, %v619_v57  ;;  %v620_v60 = vmul.f32 %v618_v50, %v614_v58 }
 0x33a   : > { %627 = vst [vmem:[#allocation2] sm:$0xff] %v625_v59  ;;  %629 = vst [vmem:[%s1452_s2] sm:$0xff] %v625_v59  ;;  %v626_v61 = vadd.f32 %v624_v54, %v620_v60 }
 0x33c   : > { %628 = vst [vmem:[#allocation2 + $0x8] sm:$0xff] %v626_v61  ;;  %630 = vst [vmem:[%s1452_s2 + $0x8] sm:$0xff] %v626_v61 }
 0x33d   : > { %1104 = shalt.err (!%p1101_p6)
}
 0x33e   : > { %s1105_s11 = scalar_lea.hbm %s1498_s28, 256  ;;  %s1109_s27 = scalar_lea.hbm %s1550_s5, 768 }
 0x33f   : > { %p1106_p5 = scmp.ne.s32.totalorder %s1498_s28, %s1105_s11  ;;  %p1110_p12 = scmp.lt.u32.totalorder %s1498_s28, %s1550_s5 }
 0x340   : > { %p1111_p7 = scmp.lt.u32.totalorder %s1109_s27, %s1105_s11  ;;  %p1113_p1 = scmp.lt.u32.totalorder %s1105_s11, %s1498_s28 }
 0x341   : > { %p1107_p13 = pnand %p1106_p5, %p1592_p11 }
 0x342   : > { %p1112_p9 = por %p1111_p7, %p1110_p12 }
 0x343   : > { %p1108_p3 = pneg %p1107_p13 }
 0x344   : > { %p1114_p8 = por %p1113_p1, %p1112_p9 }
 0x346   : > { %p1115_p10 = pnand %p1114_p8, %p1108_p3 }
 0x348   : > { %1118 = shalt.err (!%p1115_p10)
}
 0x349   : > { %s1178_s9 = smov 128   ;;  %s1179_s0 = smov 384  }
 0x34a   : > { %s1180_s2 = smov 8  }
 0x34b   : > { %889 = dma.vmem_to_hbm [thread:$0]  (%p1592_p11), %s1500_s16, 256, %s1498_s28, %s632_s22, %s1178_s9, %s1179_s0, %s1180_s2  }
 0x34c PF: > { %p914_p2 = scmp.ge.s32.totalorder %s1165_s21, 2  ;;  %s659_s29 = sand.u32 1, %s1153_s18  }
 0x34d   : > { %p1593_p4 = scmp.ne.s32.totalorder %s1569_s6, 0  ;;  %s660_s13 = scalar_lea.sflag [#allocation5], %s659_s29 }
 0x34f   : > { %p906_p0 = pnand %p914_p2, %p1593_p4 }
 0x351   : > { %1148 = dma.done.wait (!%p906_p0), %s660_s13, 256  }
 0x352   : > { %1150 = vsyncadd (!%p906_p0), %s660_s13, 4294967040  ;;  %s1594_s25 = sld [smem:[#allocation15_spill]]  ;;  %p17_p6 = scmp.ge.s32.totalorder %s1236_s24, 5  }
 0x353   : > { %s1595_s18 = smov %s1157_s19  ;;  %s1596_s19 = smov %s1161_s20 }
 0x354   : > { %s1598_s21 = smov %s1236_s24  ;;  %19 = sbr.rel (!%p17_p6) target bundleno = 8 (0x8), region = 110 }
 0x358   : > { %s1597_s20 = smov %s1594_s25 }
 0x35b   :  { %665 = vsyncpa [#allocation4], 1 }
 0x35c   :  { %667 = vsyncpa [#allocation4 + $0x1], 1 }
 0x35d   :  { %668 = vsyncpa [#allocation7], 1 }
 0x35e   :  { %669 = vsyncpa [#allocation5], 1 }
 0x35f   :  { %671 = vsyncpa [#allocation5 + $0x1], 1 }

</bundles_post_ra>
